<compile_context>
chip_gen: v5e
topology: v5e:2x2
jax: 0.10.0
libtpu: 0.0.40
codegen_flags: <defaults>
</compile_context>

<pallas_src>
import functools

import jax
import jax.numpy as jnp
from jax.experimental import pallas as pl
from jax.experimental.pallas import tpu as pltpu

LANE = 128        # lane width (last-dim tiling unit)
SUBLANE = 8       # sublane height (second-last-dim tiling unit)
MAX_TILE_B = 1024 # activation tiles stay << VMEM at these feature sizes
MIN_GRID = 2      # give both v7x TensorCores work when the batch allows it
VMEM_LIMIT_BYTES = 32 * 1024 * 1024  # safe on v5e/v6e/v7x


def _cdiv(a, b):
    return -(-a // b)


def _round_up(n, m):
    return _cdiv(n, m) * m


# ---------------------------------------------------------------------------
# Kernel: all three linears + ReLUs fused, one batch tile per grid step.
# bf16 MXU operands, f32 accumulation; bias add / ReLU on the VPU in f32.
# ---------------------------------------------------------------------------
def _generator_kernel(x_ref, w1_ref, w2_ref, w3_ref, b1_ref, b2_ref, b3_ref,
                      o_ref):
    x = x_ref[...].astype(jnp.bfloat16)

    h1 = jnp.dot(x, w1_ref[...], preferred_element_type=jnp.float32)
    h1 = jnp.maximum(h1 + b1_ref[...], 0.0)

    h2 = jnp.dot(h1.astype(jnp.bfloat16), w2_ref[...],
                 preferred_element_type=jnp.float32)
    h2 = jnp.maximum(h2 + b2_ref[...], 0.0)

    h3 = jnp.dot(h2.astype(jnp.bfloat16), w3_ref[...],
                 preferred_element_type=jnp.float32)
    # f32 accumulate throughout; store in the caller's activation dtype.
    o_ref[...] = (h3 + b3_ref[...]).astype(o_ref.dtype)


# ---------------------------------------------------------------------------
# One-time parameter preparation (do once, reuse across calls):
#   * cast weights to bf16 for the MXU,
#   * zero-pad only the hidden dim (lane-dense resident weights / h1 / h2),
#   * keep the input and output feature dims at their true sizes so the
#     HBM-facing activation / output tiles carry no padding.
# ---------------------------------------------------------------------------
def prepare_params(params):
    w1, b1 = params["w1"], params["b1"]   # (in, h),  (1, h)
    w2, b2 = params["w2"], params["b2"]   # (h, h),   (1, h)
    w3, b3 = params["w3"], params["b3"]   # (h, out), (1, out)

    in_size, hidden = w1.shape
    out_size = w3.shape[1]
    h_pad = _round_up(hidden, LANE)

    w1p = (jnp.zeros((in_size, h_pad), jnp.bfloat16)
           .at[:, :hidden].set(w1.astype(jnp.bfloat16)))
    w2p = (jnp.zeros((h_pad, h_pad), jnp.bfloat16)
           .at[:hidden, :hidden].set(w2.astype(jnp.bfloat16)))
    w3p = (jnp.zeros((h_pad, out_size), jnp.bfloat16)
           .at[:hidden, :].set(w3.astype(jnp.bfloat16)))

    b1p = jnp.zeros((1, h_pad), jnp.float32).at[:, :hidden].set(b1)
    b2p = jnp.zeros((1, h_pad), jnp.float32).at[:, :hidden].set(b2)
    b3p = b3.astype(jnp.float32)          # (1, out_size), unpadded

    return w1p, w2p, w3p, b1p, b2p, b3p


def _choose_batch_tiling(batch):
    """Pick (tile_b, grid_b): >=2 tiles when possible (v7x megacore), padding
    limited to <SUBLANE rows, tiles capped so they stay tiny in VMEM."""
    n_tiles = _cdiv(batch, MAX_TILE_B)
    if batch >= MIN_GRID * SUBLANE:
        n_tiles = max(n_tiles, MIN_GRID)
    tile_b = _round_up(_cdiv(batch, n_tiles), SUBLANE)
    grid_b = _cdiv(batch, tile_b)
    return tile_b, grid_b


# ---------------------------------------------------------------------------
# Wrapper: jit-ted, batch-tiled pallas_call with VMEM-resident weights.
# ---------------------------------------------------------------------------
@functools.partial(jax.jit, static_argnames=("single_buffer_resident",))
def generator_forward(x, w1p, w2p, w3p, b1p, b2p, b3p, *,
                      single_buffer_resident=True):
    batch, in_size = x.shape
    out_size = w3p.shape[1]

    tile_b, grid_b = _choose_batch_tiling(batch)
    b_pad = tile_b * grid_b

    # Pad only the batch dim (if needed); fuses with the pallas_call under jit.
    xp = x if b_pad == batch else jnp.pad(x, ((0, b_pad - batch), (0, 0)))

    if single_buffer_resident:
        # Constant-index (resident) operands gain nothing from double
        # buffering; a single buffer halves their VMEM footprint.
        def resident(shape):
            return pl.BlockSpec(shape, lambda i: (0, 0),
                                pipeline_mode=pl.Buffered(1))
    else:
        def resident(shape):
            return pl.BlockSpec(shape, lambda i: (0, 0))

    out = pl.pallas_call(
        _generator_kernel,
        out_shape=jax.ShapeDtypeStruct((b_pad, out_size), x.dtype),
        grid=(grid_b,),
        in_specs=[
            # Streamed activations: true feature width (full-dim exception),
            # double-buffered across the batch grid.
            pl.BlockSpec((tile_b, in_size), lambda i: (i, 0)),
            # VMEM-resident weights + biases.
            resident(w1p.shape),
            resident(w2p.shape),
            resident(w3p.shape),
            resident(b1p.shape),
            resident(b2p.shape),
            resident(b3p.shape),
        ],
        # True output width: ~16x less HBM write traffic than padding to 128.
        out_specs=pl.BlockSpec((tile_b, out_size), lambda i: (i, 0)),
        compiler_params=pltpu.CompilerParams(
            dimension_semantics=("parallel",),
            vmem_limit_bytes=VMEM_LIMIT_BYTES),
    )(xp, w1p, w2p, w3p, b1p, b2p, b3p)

    return out if b_pad == batch else out[:batch]


# ---------------------------------------------------------------------------
# Param init (mirrors nn.Linear) + pure-JAX f32 reference.
# ---------------------------------------------------------------------------
def init_params(key, input_size, hidden_size, output_size):
    """PyTorch stores weight as (out, in); we store the transpose (in, out)."""
    ks = jax.random.split(key, 6)

    def linear(kw, kb, fan_in, fan_out):
        bound = 1.0 / jnp.sqrt(fan_in)
        w = jax.random.uniform(kw, (fan_in, fan_out), jnp.float32,
                               -bound, bound)
        b = jax.random.uniform(kb, (1, fan_out), jnp.float32, -bound, bound)
        return w, b

    w1, b1 = linear(ks[0], ks[1], input_size, hidden_size)
    w2, b2 = linear(ks[2], ks[3], hidden_size, hidden_size)
    w3, b3 = linear(ks[4], ks[5], hidden_size, output_size)
    return {"w1": w1, "b1": b1, "w2": w2, "b2": b2, "w3": w3, "b3": b3}


def reference_forward(x, p):
    h = jnp.maximum(x @ p["w1"] + p["b1"], 0.0)
    h = jnp.maximum(h @ p["w2"] + p["b2"], 0.0)
    return h @ p["w3"] + p["b3"]


if __name__ == "__main__":
    input_size, hidden_size, output_size = 8, 32, 8
    batch = 16

    key = jax.random.PRNGKey(0)
    k_x, k_p = jax.random.split(key)

    x = jax.random.normal(k_x, (batch, input_size), jnp.float32)
    params = init_params(k_p, input_size, hidden_size, output_size)

    padded = prepare_params(params)   # one-time bf16 cast / hidden-dim padding

    try:
        out = generator_forward(x, *padded)
    except Exception:
        # Fallback for jax versions without BlockSpec pipeline_mode support
        # (identical math, default double-buffered resident operands).
        out = generator_forward(x, *padded, single_buffer_resident=False)
    out = jax.block_until_ready(out)

    ref = reference_forward(x, params)
    assert out.shape == (batch, output_size)
    # bf16 matmul operands with f32 accumulation -> loosened tolerance vs the
    # f32 reference (error here is ~1e-3; margin is comfortable).
    assert jnp.allclose(out, ref, atol=2e-2, rtol=2e-2), "mismatch vs reference"

    print("KERNEL_OK")
</pallas_src>

<mosaic_0001>
module attributes {stable_mosaic.version = 11 : i64} {
  func.func @_generator_kernel(%arg0: i32, %arg1: memref<8x8xf32, #tpu.memory_space<vmem>>, %arg2: memref<8x128xbf16, #tpu.memory_space<vmem>>, %arg3: memref<128x128xbf16, #tpu.memory_space<vmem>>, %arg4: memref<128x8xbf16, #tpu.memory_space<vmem>>, %arg5: memref<1x128xf32, #tpu.memory_space<vmem>>, %arg6: memref<1x128xf32, #tpu.memory_space<vmem>>, %arg7: memref<1x8xf32, #tpu.memory_space<vmem>>, %arg8: memref<8x8xf32, #tpu.memory_space<vmem>>) attributes {dimension_semantics = [#tpu.dimension_semantics<parallel>], iteration_bounds = array<i64: 2>, scalar_prefetch = 0 : i64, scratch_operands = 0 : i64, tpu.core_type = #tpu.core_type<tc>, window_params = [{transform_indices = @transform_0, window_bounds = array<i64: 8, 8>}, {pipeline_mode = #tpu.pipeline_mode<synchronous>, transform_indices = @transform_1, window_bounds = array<i64: 8, 128>}, {pipeline_mode = #tpu.pipeline_mode<synchronous>, transform_indices = @transform_2, window_bounds = array<i64: 128, 128>}, {pipeline_mode = #tpu.pipeline_mode<synchronous>, transform_indices = @transform_3, window_bounds = array<i64: 128, 8>}, {pipeline_mode = #tpu.pipeline_mode<synchronous>, transform_indices = @transform_4, window_bounds = array<i64: 1, 128>}, {pipeline_mode = #tpu.pipeline_mode<synchronous>, transform_indices = @transform_5, window_bounds = array<i64: 1, 128>}, {pipeline_mode = #tpu.pipeline_mode<synchronous>, transform_indices = @transform_6, window_bounds = array<i64: 1, 8>}, {transform_indices = @transform_7, window_bounds = array<i64: 8, 8>}]} {
    %c0 = arith.constant 0 : index
    %c0_0 = arith.constant 0 : index
    %0 = vector.load %arg1[%c0, %c0_0] : memref<8x8xf32, #tpu.memory_space<vmem>>, vector<8x8xf32>
    %1 = arith.truncf %0 : vector<8x8xf32> to vector<8x8xbf16>
    %c0_1 = arith.constant 0 : index
    %c0_2 = arith.constant 0 : index
    %2 = vector.load %arg2[%c0_1, %c0_2] : memref<8x128xbf16, #tpu.memory_space<vmem>>, vector<8x128xbf16>
    %cst = arith.constant dense<0.000000e+00> : vector<8x128xf32>
    %3 = tpu.matmul %1, %2, %cst {dimension_numbers = #tpu.dot_dimension_numbers<[1], [0], [0], [1], [0, 0, 1, 1], [], []>} : vector<8x8xbf16>, vector<8x128xbf16>, vector<8x128xf32> -> vector<8x128xf32>
    %c0_3 = arith.constant 0 : index
    %c0_4 = arith.constant 0 : index
    %4 = vector.load %arg5[%c0_3, %c0_4] : memref<1x128xf32, #tpu.memory_space<vmem>>, vector<1x128xf32>
    %5 = vector.broadcast %4 : vector<1x128xf32> to vector<8x128xf32>
    %6 = arith.addf %3, %5 : vector<8x128xf32>
    %cst_5 = arith.constant 0.000000e+00 : f32
    %7 = vector.broadcast %cst_5 : f32 to vector<8x128xf32>
    %8 = arith.maximumf %6, %7 : vector<8x128xf32>
    %9 = arith.truncf %8 : vector<8x128xf32> to vector<8x128xbf16>
    %c0_6 = arith.constant 0 : index
    %c0_7 = arith.constant 0 : index
    %10 = vector.load %arg3[%c0_6, %c0_7] : memref<128x128xbf16, #tpu.memory_space<vmem>>, vector<128x128xbf16>
    %cst_8 = arith.constant dense<0.000000e+00> : vector<8x128xf32>
    %11 = tpu.matmul %9, %10, %cst_8 {dimension_numbers = #tpu.dot_dimension_numbers<[1], [0], [0], [1], [0, 0, 1, 1], [], []>} : vector<8x128xbf16>, vector<128x128xbf16>, vector<8x128xf32> -> vector<8x128xf32>
    %c0_9 = arith.constant 0 : index
    %c0_10 = arith.constant 0 : index
    %12 = vector.load %arg6[%c0_9, %c0_10] : memref<1x128xf32, #tpu.memory_space<vmem>>, vector<1x128xf32>
    %13 = vector.broadcast %12 : vector<1x128xf32> to vector<8x128xf32>
    %14 = arith.addf %11, %13 : vector<8x128xf32>
    %cst_11 = arith.constant 0.000000e+00 : f32
    %15 = vector.broadcast %cst_11 : f32 to vector<8x128xf32>
    %16 = arith.maximumf %14, %15 : vector<8x128xf32>
    %17 = arith.truncf %16 : vector<8x128xf32> to vector<8x128xbf16>
    %c0_12 = arith.constant 0 : index
    %c0_13 = arith.constant 0 : index
    %18 = vector.load %arg4[%c0_12, %c0_13] : memref<128x8xbf16, #tpu.memory_space<vmem>>, vector<128x8xbf16>
    %cst_14 = arith.constant dense<0.000000e+00> : vector<8x8xf32>
    %19 = tpu.matmul %17, %18, %cst_14 {dimension_numbers = #tpu.dot_dimension_numbers<[1], [0], [0], [1], [0, 0, 1, 1], [], []>} : vector<8x128xbf16>, vector<128x8xbf16>, vector<8x8xf32> -> vector<8x8xf32>
    %c0_15 = arith.constant 0 : index
    %c0_16 = arith.constant 0 : index
    %20 = vector.load %arg7[%c0_15, %c0_16] : memref<1x8xf32, #tpu.memory_space<vmem>>, vector<1x8xf32>
    %21 = vector.broadcast %20 : vector<1x8xf32> to vector<8x8xf32>
    %22 = arith.addf %19, %21 : vector<8x8xf32>
    %c0_17 = arith.constant 0 : index
    %c0_18 = arith.constant 0 : index
    %23 = vector.load %arg8[%c0_17, %c0_18] : memref<8x8xf32, #tpu.memory_space<vmem>>, vector<8x8xf32>
    tpu.vector_store %arg8[%c0_17, %c0_18], %22 {strides = array<i32>} : memref<8x8xf32, #tpu.memory_space<vmem>>, vector<8x8xf32>,
    return
  }
  func.func @transform_0(%arg0: i32) -> (i32, i32) {
    %c0_i32 = arith.constant 0 : i32
    %c0_i32_0 = arith.constant 0 : i32
    return %arg0, %c0_i32 : i32, i32
  }
  func.func @transform_1(%arg0: i32) -> (i32, i32) {
    %c0_i32 = arith.constant 0 : i32
    %c0_i32_0 = arith.constant 0 : i32
    %c0_i32_1 = arith.constant 0 : i32
    return %c0_i32, %c0_i32_0 : i32, i32
  }
  func.func @transform_2(%arg0: i32) -> (i32, i32) {
    %c0_i32 = arith.constant 0 : i32
    %c0_i32_0 = arith.constant 0 : i32
    %c0_i32_1 = arith.constant 0 : i32
    return %c0_i32, %c0_i32_0 : i32, i32
  }
  func.func @transform_3(%arg0: i32) -> (i32, i32) {
    %c0_i32 = arith.constant 0 : i32
    %c0_i32_0 = arith.constant 0 : i32
    %c0_i32_1 = arith.constant 0 : i32
    return %c0_i32, %c0_i32_0 : i32, i32
  }
  func.func @transform_4(%arg0: i32) -> (i32, i32) {
    %c0_i32 = arith.constant 0 : i32
    %c0_i32_0 = arith.constant 0 : i32
    %c0_i32_1 = arith.constant 0 : i32
    return %c0_i32, %c0_i32_0 : i32, i32
  }
  func.func @transform_5(%arg0: i32) -> (i32, i32) {
    %c0_i32 = arith.constant 0 : i32
    %c0_i32_0 = arith.constant 0 : i32
    %c0_i32_1 = arith.constant 0 : i32
    return %c0_i32, %c0_i32_0 : i32, i32
  }
  func.func @transform_6(%arg0: i32) -> (i32, i32) {
    %c0_i32 = arith.constant 0 : i32
    %c0_i32_0 = arith.constant 0 : i32
    %c0_i32_1 = arith.constant 0 : i32
    return %c0_i32, %c0_i32_0 : i32, i32
  }
  func.func @transform_7(%arg0: i32) -> (i32, i32) {
    %c0_i32 = arith.constant 0 : i32
    %c0_i32_0 = arith.constant 0 : i32
    return %arg0, %c0_i32 : i32, i32
  }
}

module attributes {stable_mosaic.version = 11 : i64} {
  func.func @_generator_kernel(%arg0: i32, %arg1: memref<8x8xf32, #tpu.memory_space<vmem>>, %arg2: memref<8x128xbf16, #tpu.memory_space<vmem>>, %arg3: memref<128x128xbf16, #tpu.memory_space<vmem>>, %arg4: memref<128x8xbf16, #tpu.memory_space<vmem>>, %arg5: memref<1x128xf32, #tpu.memory_space<vmem>>, %arg6: memref<1x128xf32, #tpu.memory_space<vmem>>, %arg7: memref<1x8xf32, #tpu.memory_space<vmem>>, %arg8: memref<8x8xf32, #tpu.memory_space<vmem>>) attributes {dimension_semantics = [#tpu.dimension_semantics<parallel>], iteration_bounds = array<i64: 2>, scalar_prefetch = 0 : i64, scratch_operands = 0 : i64, tpu.core_type = #tpu.core_type<tc>, window_params = [{transform_indices = @transform_0, window_bounds = array<i64: 8, 8>}, {pipeline_mode = #tpu.pipeline_mode<synchronous>, transform_indices = @transform_1, window_bounds = array<i64: 8, 128>}, {pipeline_mode = #tpu.pipeline_mode<synchronous>, transform_indices = @transform_2, window_bounds = array<i64: 128, 128>}, {pipeline_mode = #tpu.pipeline_mode<synchronous>, transform_indices = @transform_3, window_bounds = array<i64: 128, 8>}, {pipeline_mode = #tpu.pipeline_mode<synchronous>, transform_indices = @transform_4, window_bounds = array<i64: 1, 128>}, {pipeline_mode = #tpu.pipeline_mode<synchronous>, transform_indices = @transform_5, window_bounds = array<i64: 1, 128>}, {pipeline_mode = #tpu.pipeline_mode<synchronous>, transform_indices = @transform_6, window_bounds = array<i64: 1, 8>}, {transform_indices = @transform_7, window_bounds = array<i64: 8, 8>}]} {
    %c0 = arith.constant 0 : index
    %c0_0 = arith.constant 0 : index
    %0 = vector.load %arg1[%c0, %c0_0] : memref<8x8xf32, #tpu.memory_space<vmem>>, vector<8x8xf32>
    %1 = arith.truncf %0 : vector<8x8xf32> to vector<8x8xbf16>
    %c0_1 = arith.constant 0 : index
    %c0_2 = arith.constant 0 : index
    %2 = vector.load %arg2[%c0_1, %c0_2] : memref<8x128xbf16, #tpu.memory_space<vmem>>, vector<8x128xbf16>
    %cst = arith.constant dense<0.000000e+00> : vector<8x128xf32>
    %3 = tpu.matmul %1, %2, %cst {dimension_numbers = #tpu.dot_dimension_numbers<[1], [0], [0], [1], [0, 0, 1, 1], [], []>} : vector<8x8xbf16>, vector<8x128xbf16>, vector<8x128xf32> -> vector<8x128xf32>
    %c0_3 = arith.constant 0 : index
    %c0_4 = arith.constant 0 : index
    %4 = vector.load %arg5[%c0_3, %c0_4] : memref<1x128xf32, #tpu.memory_space<vmem>>, vector<1x128xf32>
    %5 = vector.broadcast %4 : vector<1x128xf32> to vector<8x128xf32>
    %6 = arith.addf %3, %5 : vector<8x128xf32>
    %cst_5 = arith.constant 0.000000e+00 : f32
    %7 = vector.broadcast %cst_5 : f32 to vector<8x128xf32>
    %8 = arith.maximumf %6, %7 : vector<8x128xf32>
    %9 = arith.truncf %8 : vector<8x128xf32> to vector<8x128xbf16>
    %c0_6 = arith.constant 0 : index
    %c0_7 = arith.constant 0 : index
    %10 = vector.load %arg3[%c0_6, %c0_7] : memref<128x128xbf16, #tpu.memory_space<vmem>>, vector<128x128xbf16>
    %cst_8 = arith.constant dense<0.000000e+00> : vector<8x128xf32>
    %11 = tpu.matmul %9, %10, %cst_8 {dimension_numbers = #tpu.dot_dimension_numbers<[1], [0], [0], [1], [0, 0, 1, 1], [], []>} : vector<8x128xbf16>, vector<128x128xbf16>, vector<8x128xf32> -> vector<8x128xf32>
    %c0_9 = arith.constant 0 : index
    %c0_10 = arith.constant 0 : index
    %12 = vector.load %arg6[%c0_9, %c0_10] : memref<1x128xf32, #tpu.memory_space<vmem>>, vector<1x128xf32>
    %13 = vector.broadcast %12 : vector<1x128xf32> to vector<8x128xf32>
    %14 = arith.addf %11, %13 : vector<8x128xf32>
    %cst_11 = arith.constant 0.000000e+00 : f32
    %15 = vector.broadcast %cst_11 : f32 to vector<8x128xf32>
    %16 = arith.maximumf %14, %15 : vector<8x128xf32>
    %17 = arith.truncf %16 : vector<8x128xf32> to vector<8x128xbf16>
    %c0_12 = arith.constant 0 : index
    %c0_13 = arith.constant 0 : index
    %18 = vector.load %arg4[%c0_12, %c0_13] : memref<128x8xbf16, #tpu.memory_space<vmem>>, vector<128x8xbf16>
    %cst_14 = arith.constant dense<0.000000e+00> : vector<8x8xf32>
    %19 = tpu.matmul %17, %18, %cst_14 {dimension_numbers = #tpu.dot_dimension_numbers<[1], [0], [0], [1], [0, 0, 1, 1], [], []>} : vector<8x128xbf16>, vector<128x8xbf16>, vector<8x8xf32> -> vector<8x8xf32>
    %c0_15 = arith.constant 0 : index
    %c0_16 = arith.constant 0 : index
    %20 = vector.load %arg7[%c0_15, %c0_16] : memref<1x8xf32, #tpu.memory_space<vmem>>, vector<1x8xf32>
    %21 = vector.broadcast %20 : vector<1x8xf32> to vector<8x8xf32>
    %22 = arith.addf %19, %21 : vector<8x8xf32>
    %c0_17 = arith.constant 0 : index
    %c0_18 = arith.constant 0 : index
    %23 = vector.load %arg8[%c0_17, %c0_18] : memref<8x8xf32, #tpu.memory_space<vmem>>, vector<8x8xf32>
    tpu.vector_store %arg8[%c0_17, %c0_18], %22 {strides = array<i32>} : memref<8x8xf32, #tpu.memory_space<vmem>>, vector<8x8xf32>,
    return
  }
  func.func @transform_0(%arg0: i32) -> (i32, i32) {
    %c0_i32 = arith.constant 0 : i32
    %c0_i32_0 = arith.constant 0 : i32
    return %arg0, %c0_i32 : i32, i32
  }
  func.func @transform_1(%arg0: i32) -> (i32, i32) {
    %c0_i32 = arith.constant 0 : i32
    %c0_i32_0 = arith.constant 0 : i32
    %c0_i32_1 = arith.constant 0 : i32
    return %c0_i32, %c0_i32_0 : i32, i32
  }
  func.func @transform_2(%arg0: i32) -> (i32, i32) {
    %c0_i32 = arith.constant 0 : i32
    %c0_i32_0 = arith.constant 0 : i32
    %c0_i32_1 = arith.constant 0 : i32
    return %c0_i32, %c0_i32_0 : i32, i32
  }
  func.func @transform_3(%arg0: i32) -> (i32, i32) {
    %c0_i32 = arith.constant 0 : i32
    %c0_i32_0 = arith.constant 0 : i32
    %c0_i32_1 = arith.constant 0 : i32
    return %c0_i32, %c0_i32_0 : i32, i32
  }
  func.func @transform_4(%arg0: i32) -> (i32, i32) {
    %c0_i32 = arith.constant 0 : i32
    %c0_i32_0 = arith.constant 0 : i32
    %c0_i32_1 = arith.constant 0 : i32
    return %c0_i32, %c0_i32_0 : i32, i32
  }
  func.func @transform_5(%arg0: i32) -> (i32, i32) {
    %c0_i32 = arith.constant 0 : i32
    %c0_i32_0 = arith.constant 0 : i32
    %c0_i32_1 = arith.constant 0 : i32
    return %c0_i32, %c0_i32_0 : i32, i32
  }
  func.func @transform_6(%arg0: i32) -> (i32, i32) {
    %c0_i32 = arith.constant 0 : i32
    %c0_i32_0 = arith.constant 0 : i32
    %c0_i32_1 = arith.constant 0 : i32
    return %c0_i32, %c0_i32_0 : i32, i32
  }
  func.func @transform_7(%arg0: i32) -> (i32, i32) {
    %c0_i32 = arith.constant 0 : i32
    %c0_i32_0 = arith.constant 0 : i32
    return %arg0, %c0_i32 : i32, i32
  }
}

</mosaic_0001>

<bundles_post_ra>
// kernel: generator_forward.1
= control target key start
LH: loop header
LB: loop body
LE: loop exit
PB: predicated region body
PF: predicated region fallthrough
CT: control target
= control target key end

     0   :  { %s672_s24 = smov 0   ;;  %s758_s0 = inlined_call_operand.vmem [shape: f32[16,8], index: 0, kind: input, shape index: {}]   ;;  %s759_s1 = inlined_call_operand.vmem [shape: bf16[8,128], index: 1, kind: input, shape index: {}]   ;;  %s760_s2 = inlined_call_operand.vmem [shape: bf16[128,128], index: 2, kind: input, shape index: {}]   ;;  %s761_s3 = inlined_call_operand.vmem [shape: bf16[128,8], index: 3, kind: input, shape index: {}]   ;;  %s762_s4 = inlined_call_operand.vmem [shape: f32[1,128], index: 4, kind: input, shape index: {}]   ;;  %s763_s5 = inlined_call_operand.vmem [shape: f32[1,128], index: 5, kind: input, shape index: {}]   ;;  %s764_s6 = inlined_call_operand.vmem [shape: f32[1,8], index: 6, kind: input, shape index: {}]   ;;  %s765_s7 = inlined_call_operand.vmem [shape: f32[16,8], index: 7, kind: output, shape index: {}]  }
   0x1 LB: > { %s523_s25 = sadd.s32 4294967295, %s630_s24   ;;  %p527_p0 = scmp.ge.s32.totalorder %s630_s24, 1  ;;  %s630_s24 = sphi %s672_s24, %s17_s24  }
   0x2   : > { %p236_p1 = scmp.lt.s32.totalorder %s630_s24, 3 }
   0x4   : > { %p237_p2 = pnand %p527_p0, %p236_p1 }
   0x5   : > { %p266_p3 = scmp.lt.s32.totalorder (!%p237_p2), %s523_s25, 1 }
   0x6   : > { %240 = sbr.rel (%p237_p2) target bundleno = 421 (0x1a5), region = 48 }
   0xb   : > { %v277_v0 = vld [vmem:[%s759_s1] sm:$0xf]  ;;  %vm286_vm0 = vcmask 1043456   ;;  %v604_v1 = vld [vmem:[%s760_s2 + $0x38] sm:$0xff]  ;;  %s767_s25 = smov (!%p266_p3, %s523_s25), 1  ;;  %v603_v3 = vld [vmem:[%s760_s2 + $0x30] sm:$0xff] }
   0xc   : > { %v288_v2 = vsel %vm286_vm0, %v277_v0, 0  ;;  %373 = vmatpush.bf16.msra.mxu1 %v604_v1  ;;  %s528_s9 = sshll.u32 %s767_s25, 3  ;;  %vm282_vm1 = vcmask 64512   ;;  %v602_v5 = vld [vmem:[%s760_s2 + $0x28] sm:$0xff]  ;;  %v601_v7 = vld [vmem:[%s760_s2 + $0x20] sm:$0xff]  ;;  %v600_v8 = vld [vmem:[%s760_s2 + $0x18] sm:$0xff] }
   0xd   : > { %297 = vmatpush.bf16.msra.mxu0 %v288_v2  ;;  %s269_s12 = scalar_lea.vmem %s758_s0, %s528_s9  ;;  %v599_v9 = vld [vmem:[%s760_s2 + $0x10] sm:$0xff]  ;;  %v598_v10 = vld [vmem:[%s760_s2 + $0x8] sm:$0xff]  ;;  %v597_v11 = vld [vmem:[%s760_s2] sm:$0xff]  ;;  %s273_s8 = scalar_lea.vmem %s765_s7, %s528_s9 }
   0xe   : > { %v275_v4 = vld [vmem:[%s269_s12] sm:$0xff]  ;;  %v612_v12 = vld [vmem:[%s761_s3 + $0x38] sm:$0xff]  ;;  %v611_v13 = vld [vmem:[%s761_s3 + $0x30] sm:$0xff] }
   0xf   : > { %v276_v6 = vpack.c.bf16 %v275_v4, %v275_v4  ;;  %456 = vmatpush.bf16.msra.mxu2 %v612_v12  ;;  %v610_v14 = vld [vmem:[%s761_s3 + $0x28] sm:$0xff]  ;;  %v609_v15 = vld [vmem:[%s761_s3 + $0x20] sm:$0xff]  ;;  %v608_v16 = vld [vmem:[%s761_s3 + $0x18] sm:$0xff] }
  0x10   : > { %374 = vmatpush.bf16.msra.mxu1 %v603_v3  ;;  %v607_v17 = vld [vmem:[%s761_s3 + $0x10] sm:$0xff]  ;;  %v621_v18 = vld [vmem:[%s762_s4] ss:$0 sm:$0xff]  ;;  %v606_v24 = vld [vmem:[%s761_s3 + $0x8] sm:$0xff] }
  0x11   : > { %530 = vmatmul.msk.bf16.vlgmr.msra.gmra.mxu0 %vm282_vm1, %v276_v6  ;;  %v605_v25 = vld [vmem:[%s761_s3] sm:$0xff] }
  0x12   : > { %v622_v26 = vld [vmem:[%s763_s5] ss:$0 sm:$0xff] }
  0x13   : > { %457 = vmatpush.bf16.msra.mxu2 %v611_v13  ;;  %v623_v32 = vld [vmem:[%s764_s6] ss:$0 sm:$0xff] }
  0x14   : > { %375 = vmatpush.bf16.msra.mxu1 %v602_v5 }
  0x17   : > { %458 = vmatpush.bf16.msra.mxu2 %v610_v14 }
  0x18   : > { %376 = vmatpush.bf16.msra.mxu1 %v601_v7 }
  0x1b   : > { %459 = vmatpush.bf16.msra.mxu2 %v609_v15 }
  0x1c   : > { %377 = vmatpush.bf16.msra.mxu1 %v600_v8 }
  0x1f   : > { %460 = vmatpush.bf16.msra.mxu2 %v608_v16 }
  0x20   : > { %378 = vmatpush.bf16.msra.mxu1 %v599_v9 }
  0x23   : > { %461 = vmatpush.bf16.msra.mxu2 %v607_v17 }
  0x24   : > { %379 = vmatpush.bf16.msra.mxu1 %v598_v10 }
  0x27   : > { %462 = vmatpush.bf16.msra.mxu2 %v606_v24 }
  0x28   : > { %380 = vmatpush.bf16.msra.mxu1 %v597_v11 }
  0x2b   : > { %463 = vmatpush.bf16.msra.mxu2 %v605_v25 }
  0x8e   : > { %v299_v19 = vpop.f32.mrf.mxu0 }
  0x8f   : > { %v300_v20 = vadd.f32 %v621_v18, %v299_v19 }
  0x91   : > { %v303_v21 = vmax.f32 %v300_v20, 0.0 }
  0x93   : > { %v304_v22 = vpack.c.bf16 %v303_v21, %v303_v21 }
  0x95   : > { %381 = vmatmul.bf16.vlgmr.msra.gmra.mxu1 %v304_v22 }
  0x96   : > { %v301_v23 = vpop.f32.mrf.mxu0 }
 0x112   : > { %v382_v27 = vpop.f32.mrf.mxu1 }
 0x113   : > { %v383_v28 = vadd.f32 %v622_v26, %v382_v27 }
 0x115   : > { %v386_v29 = vmax.f32 %v383_v28, 0.0 }
 0x117   : > { %v387_v30 = vpack.c.bf16 %v386_v29, %v386_v29 }
 0x119   : > { %464 = vmatmul.bf16.vlgmr.msra.gmra.mxu2 %v387_v30 }
 0x11a   : > { %v384_v31 = vpop.f32.mrf.mxu1 }
 0x19c   : > { %v465_v33 = vpop.f32.mrf.mxu2 }
 0x19d   : > { %v466_v34 = vadd.f32 %v623_v32, %v465_v33 }
 0x19f   : > { %469 = vst.msk [vmem:[%s273_s8] sm:$0xff] %vm282_vm1, %v466_v34 }
 0x1a4   : > { %v467_v35 = vpop.f32.mrf.mxu2 }
 0x1a5 PF: > { %s17_s24 = sadd.s32 1, %s630_s24  }
 0x1a6   : > { %p14_p4 = scmp.ge.s32.totalorder %s17_s24, 4  }
 0x1a8   :  { %16 = sbr.rel (!%p14_p4) target bundleno = 1 (0x1), region = 78 }

// kernel: generator_forward.1
= control target key start
LH: loop header
LB: loop body
LE: loop exit
PB: predicated region body
PF: predicated region fallthrough
CT: control target
= control target key end

     0   :  { %s672_s24 = smov 0   ;;  %s758_s0 = inlined_call_operand.vmem [shape: f32[16,8], index: 0, kind: input, shape index: {}]   ;;  %s759_s1 = inlined_call_operand.vmem [shape: bf16[8,128], index: 1, kind: input, shape index: {}]   ;;  %s760_s2 = inlined_call_operand.vmem [shape: bf16[128,128], index: 2, kind: input, shape index: {}]   ;;  %s761_s3 = inlined_call_operand.vmem [shape: bf16[128,8], index: 3, kind: input, shape index: {}]   ;;  %s762_s4 = inlined_call_operand.vmem [shape: f32[1,128], index: 4, kind: input, shape index: {}]   ;;  %s763_s5 = inlined_call_operand.vmem [shape: f32[1,128], index: 5, kind: input, shape index: {}]   ;;  %s764_s6 = inlined_call_operand.vmem [shape: f32[1,8], index: 6, kind: input, shape index: {}]   ;;  %s765_s7 = inlined_call_operand.vmem [shape: f32[16,8], index: 7, kind: output, shape index: {}]  }
   0x1 LB: > { %s523_s25 = sadd.s32 4294967295, %s630_s24   ;;  %p527_p0 = scmp.ge.s32.totalorder %s630_s24, 1  ;;  %s630_s24 = sphi %s672_s24, %s17_s24  }
   0x2   : > { %p236_p1 = scmp.lt.s32.totalorder %s630_s24, 3 }
   0x4   : > { %p237_p2 = pnand %p527_p0, %p236_p1 }
   0x5   : > { %p266_p3 = scmp.lt.s32.totalorder (!%p237_p2), %s523_s25, 1 }
   0x6   : > { %240 = sbr.rel (%p237_p2) target bundleno = 421 (0x1a5), region = 48 }
   0xb   : > { %v277_v0 = vld [vmem:[%s759_s1] sm:$0xf]  ;;  %vm286_vm0 = vcmask 1043456   ;;  %v604_v1 = vld [vmem:[%s760_s2 + $0x38] sm:$0xff]  ;;  %s767_s25 = smov (!%p266_p3, %s523_s25), 1  ;;  %v603_v3 = vld [vmem:[%s760_s2 + $0x30] sm:$0xff] }
   0xc   : > { %v288_v2 = vsel %vm286_vm0, %v277_v0, 0  ;;  %373 = vmatpush.bf16.msra.mxu1 %v604_v1  ;;  %s528_s9 = sshll.u32 %s767_s25, 3  ;;  %vm282_vm1 = vcmask 64512   ;;  %v602_v5 = vld [vmem:[%s760_s2 + $0x28] sm:$0xff]  ;;  %v601_v7 = vld [vmem:[%s760_s2 + $0x20] sm:$0xff]  ;;  %v600_v8 = vld [vmem:[%s760_s2 + $0x18] sm:$0xff] }
   0xd   : > { %297 = vmatpush.bf16.msra.mxu0 %v288_v2  ;;  %s269_s12 = scalar_lea.vmem %s758_s0, %s528_s9  ;;  %v599_v9 = vld [vmem:[%s760_s2 + $0x10] sm:$0xff]  ;;  %v598_v10 = vld [vmem:[%s760_s2 + $0x8] sm:$0xff]  ;;  %v597_v11 = vld [vmem:[%s760_s2] sm:$0xff]  ;;  %s273_s8 = scalar_lea.vmem %s765_s7, %s528_s9 }
   0xe   : > { %v275_v4 = vld [vmem:[%s269_s12] sm:$0xff]  ;;  %v612_v12 = vld [vmem:[%s761_s3 + $0x38] sm:$0xff]  ;;  %v611_v13 = vld [vmem:[%s761_s3 + $0x30] sm:$0xff] }
   0xf   : > { %v276_v6 = vpack.c.bf16 %v275_v4, %v275_v4  ;;  %456 = vmatpush.bf16.msra.mxu2 %v612_v12  ;;  %v610_v14 = vld [vmem:[%s761_s3 + $0x28] sm:$0xff]  ;;  %v609_v15 = vld [vmem:[%s761_s3 + $0x20] sm:$0xff]  ;;  %v608_v16 = vld [vmem:[%s761_s3 + $0x18] sm:$0xff] }
  0x10   : > { %374 = vmatpush.bf16.msra.mxu1 %v603_v3  ;;  %v607_v17 = vld [vmem:[%s761_s3 + $0x10] sm:$0xff]  ;;  %v621_v18 = vld [vmem:[%s762_s4] ss:$0 sm:$0xff]  ;;  %v606_v24 = vld [vmem:[%s761_s3 + $0x8] sm:$0xff] }
  0x11   : > { %530 = vmatmul.msk.bf16.vlgmr.msra.gmra.mxu0 %vm282_vm1, %v276_v6  ;;  %v605_v25 = vld [vmem:[%s761_s3] sm:$0xff] }
  0x12   : > { %v622_v26 = vld [vmem:[%s763_s5] ss:$0 sm:$0xff] }
  0x13   : > { %457 = vmatpush.bf16.msra.mxu2 %v611_v13  ;;  %v623_v32 = vld [vmem:[%s764_s6] ss:$0 sm:$0xff] }
  0x14   : > { %375 = vmatpush.bf16.msra.mxu1 %v602_v5 }
  0x17   : > { %458 = vmatpush.bf16.msra.mxu2 %v610_v14 }
  0x18   : > { %376 = vmatpush.bf16.msra.mxu1 %v601_v7 }
  0x1b   : > { %459 = vmatpush.bf16.msra.mxu2 %v609_v15 }
  0x1c   : > { %377 = vmatpush.bf16.msra.mxu1 %v600_v8 }
  0x1f   : > { %460 = vmatpush.bf16.msra.mxu2 %v608_v16 }
  0x20   : > { %378 = vmatpush.bf16.msra.mxu1 %v599_v9 }
  0x23   : > { %461 = vmatpush.bf16.msra.mxu2 %v607_v17 }
  0x24   : > { %379 = vmatpush.bf16.msra.mxu1 %v598_v10 }
  0x27   : > { %462 = vmatpush.bf16.msra.mxu2 %v606_v24 }
  0x28   : > { %380 = vmatpush.bf16.msra.mxu1 %v597_v11 }
  0x2b   : > { %463 = vmatpush.bf16.msra.mxu2 %v605_v25 }
  0x8e   : > { %v299_v19 = vpop.f32.mrf.mxu0 }
  0x8f   : > { %v300_v20 = vadd.f32 %v621_v18, %v299_v19 }
  0x91   : > { %v303_v21 = vmax.f32 %v300_v20, 0.0 }
  0x93   : > { %v304_v22 = vpack.c.bf16 %v303_v21, %v303_v21 }
  0x95   : > { %381 = vmatmul.bf16.vlgmr.msra.gmra.mxu1 %v304_v22 }
  0x96   : > { %v301_v23 = vpop.f32.mrf.mxu0 }
 0x112   : > { %v382_v27 = vpop.f32.mrf.mxu1 }
 0x113   : > { %v383_v28 = vadd.f32 %v622_v26, %v382_v27 }
 0x115   : > { %v386_v29 = vmax.f32 %v383_v28, 0.0 }
 0x117   : > { %v387_v30 = vpack.c.bf16 %v386_v29, %v386_v29 }
 0x119   : > { %464 = vmatmul.bf16.vlgmr.msra.gmra.mxu2 %v387_v30 }
 0x11a   : > { %v384_v31 = vpop.f32.mrf.mxu1 }
 0x19c   : > { %v465_v33 = vpop.f32.mrf.mxu2 }
 0x19d   : > { %v466_v34 = vadd.f32 %v623_v32, %v465_v33 }
 0x19f   : > { %469 = vst.msk [vmem:[%s273_s8] sm:$0xff] %vm282_vm1, %v466_v34 }
 0x1a4   : > { %v467_v35 = vpop.f32.mrf.mxu2 }
 0x1a5 PF: > { %s17_s24 = sadd.s32 1, %s630_s24  }
 0x1a6   : > { %p14_p4 = scmp.ge.s32.totalorder %s17_s24, 4  }
 0x1a8   :  { %16 = sbr.rel (!%p14_p4) target bundleno = 1 (0x1), region = 78 }

</bundles_post_ra>
